<compile_context>
chip_gen: v6e
topology: v6e:2x2x1
jax: 0.10.0
libtpu: 0.0.40
codegen_flags: <defaults>
</compile_context>

<pallas_src>
import jax
import jax.numpy as jnp
import numpy as np
from jax.experimental import pallas as pl
from jax.experimental.pallas import tpu as pltpu


def _make_lstm_kernel(t_blk, seq_len, hidden):
    """Build the recurrence kernel for a fixed (static) time block size."""
    needs_mask = (seq_len % t_blk) != 0
    H = hidden

    def kernel(gx_ref,    # (t_blk, B, 4H)  precomputed x@W_ih^T + b for this block
               whh_ref,   # (H, 4H)         recurrent weights (transposed)
               h0_ref,    # (B, H)
               c0_ref,    # (B, H)
               hs_ref,    # (t_blk, B, H)   hidden states for this block (lane-dense)
               hn_ref,    # (B, H)          final h — also the recurrent carry
               cn_ref):   # (B, H)          final c — also the recurrent carry
        blk = pl.program_id(0)

        @pl.when(blk == 0)
        def _():
            hn_ref[...] = h0_ref[...]
            cn_ref[...] = c0_ref[...]

        h = hn_ref[...]
        c = cn_ref[...]
        whh = whh_ref[...]          # hoisted: loaded once per block

        # Statically unrolled time loop (t_blk is small and static).
        for i in range(t_blk):
            # Only the recurrent matmul sits on the serialized per-step path.
            gates = gx_ref[i] + jnp.dot(h, whh, preferred_element_type=jnp.float32)

            # PyTorch gate order [i, f, g, o].
            i_g = jax.nn.sigmoid(gates[:, 0 * H:1 * H])
            f_g = jax.nn.sigmoid(gates[:, 1 * H:2 * H])
            g_g = jnp.tanh(gates[:, 2 * H:3 * H])
            o_g = jax.nn.sigmoid(gates[:, 3 * H:4 * H])

            c_new = f_g * c + i_g * g_g
            h_new = o_g * jnp.tanh(c_new)

            if needs_mask:
                # Padded tail steps (seq_len not divisible by t_blk) must not
                # advance the carry; padded hs rows are sliced off by the wrapper.
                valid = (blk * t_blk + i) < seq_len
                c = jnp.where(valid, c_new, c)
                h = jnp.where(valid, h_new, h)
            else:
                c, h = c_new, h_new

            hs_ref[i] = h_new.astype(hs_ref.dtype)

        hn_ref[...] = h
        cn_ref[...] = c

    return kernel


def lstm_forward(x, state, params, *, t_blk=16):
    """x: (S, B, I) float32; state = (h0, c0), each (1, B, H).

    Returns (output (S, B, 1), (h_n, c_n)) matching the PyTorch module."""
    h0, c0 = state
    S, B, I = x.shape
    H = h0.shape[-1]

    t_blk = max(1, min(t_blk, S))
    num_blk = pl.cdiv(S, t_blk)
    S_pad = num_blk * t_blk

    # Weight prep (plain JAX glue).
    wih_t = params["w_ih"].T                              # (I, 4H)
    whh_t = params["w_hh"].T                              # (H, 4H)
    bias = (params["b_ih"] + params["b_hh"])[None, :]     # (1, 4H)
    # For realistic sizes on v6e/v7x: cast wih_t / whh_t (and the dot operands)
    # to bfloat16 while keeping preferred_element_type=f32 and gate math in f32.

    # (1) Batched input projection for all timesteps: one big MXU-friendly matmul
    #     with bias folded in (done by XLA outside the sequential recurrence).
    gates_x = (x.reshape(S * B, I) @ wih_t + bias).reshape(S, B, 4 * H)
    if S_pad != S:
        gates_x = jnp.pad(gates_x, ((0, S_pad - S), (0, 0), (0, 0)))

    hs, hn, cn = pl.pallas_call(
        _make_lstm_kernel(t_blk, S, H),
        out_shape=(
            jax.ShapeDtypeStruct((S_pad, B, H), jnp.float32),   # hidden-state slab
            jax.ShapeDtypeStruct((B, H), jnp.float32),          # h_n (carry)
            jax.ShapeDtypeStruct((B, H), jnp.float32),          # c_n (carry)
        ),
        grid_spec=pltpu.PrefetchScalarGridSpec(
            num_scalar_prefetch=0,
            grid=(num_blk,),
            in_specs=[
                pl.BlockSpec((t_blk, B, 4 * H), lambda t: (t, 0, 0)),   # x-gates block
                pl.BlockSpec((H, 4 * H), lambda t: (0, 0)),             # W_hh^T (resident)
                pl.BlockSpec((B, H), lambda t: (0, 0)),                 # h0
                pl.BlockSpec((B, H), lambda t: (0, 0)),                 # c0
            ],
            out_specs=[
                pl.BlockSpec((t_blk, B, H), lambda t: (t, 0, 0)),       # hidden states
                pl.BlockSpec((B, H), lambda t: (0, 0)),                 # h_n (resident carry)
                pl.BlockSpec((B, H), lambda t: (0, 0)),                 # c_n (resident carry)
            ],
        ),
        compiler_params=pltpu.CompilerParams(
            dimension_semantics=("arbitrary",),        # sequential time recurrence
            vmem_limit_bytes=32 * 1024 * 1024,
        ),
    )(gates_x, whh_t, h0.reshape(B, H), c0.reshape(B, H))

    hs = hs[:S]                                        # drop any padded tail steps

    # (2) FC head hoisted out of the recurrence: one (S*B, H) @ (H, 1) projection.
    out = (hs.reshape(S * B, H) @ params["w_fc"].T + params["b_fc"]).reshape(S, B, 1)

    return out, (hn.reshape(1, B, H), cn.reshape(1, B, H))


def lstm_forward_ref(x, state, params):
    """Pure-JAX reference mirroring torch.nn.LSTM + Linear semantics."""
    h, c = state[0][0], state[1][0]
    H = h.shape[-1]

    def step(carry, x_t):
        h, c = carry
        gates = (x_t @ params["w_ih"].T + params["b_ih"]
                 + h @ params["w_hh"].T + params["b_hh"])
        i = jax.nn.sigmoid(gates[:, 0 * H:1 * H])
        f = jax.nn.sigmoid(gates[:, 1 * H:2 * H])
        g = jnp.tanh(gates[:, 2 * H:3 * H])
        o = jax.nn.sigmoid(gates[:, 3 * H:4 * H])
        c = f * c + i * g
        h = o * jnp.tanh(c)
        return (h, c), h

    (h, c), ys = jax.lax.scan(step, (h, c), x)
    out = ys @ params["w_fc"].T + params["b_fc"]
    return out, (h[None], c[None])


def init_params(key, input_size, hidden_size):
    # Deterministic init mimicking PyTorch's U(-1/sqrt(H), 1/sqrt(H)).
    k = 1.0 / np.sqrt(hidden_size)
    ks = jax.random.split(key, 6)
    u = lambda kk, shape: jax.random.uniform(kk, shape, jnp.float32, -k, k)
    return {
        "w_ih": u(ks[0], (4 * hidden_size, input_size)),
        "w_hh": u(ks[1], (4 * hidden_size, hidden_size)),
        "b_ih": u(ks[2], (4 * hidden_size,)),
        "b_hh": u(ks[3], (4 * hidden_size,)),
        "w_fc": u(ks[4], (1, hidden_size)),
        "b_fc": u(ks[5], (1,)),
    }


if __name__ == "__main__":
    SEQ, BATCH, INPUT, HIDDEN = 8, 2, 16, 32

    key = jax.random.PRNGKey(0)
    k_p, k_x, k_h, k_c = jax.random.split(key, 4)

    params = init_params(k_p, INPUT, HIDDEN)
    x = jax.random.normal(k_x, (SEQ, BATCH, INPUT), jnp.float32)
    h0 = jax.random.normal(k_h, (1, BATCH, HIDDEN), jnp.float32)
    c0 = jax.random.normal(k_c, (1, BATCH, HIDDEN), jnp.float32)

    out, (hn, cn) = lstm_forward(x, (h0, c0), params)
    jax.block_until_ready((out, hn, cn))

    out_ref, (hn_ref, cn_ref) = lstm_forward_ref(x, (h0, c0), params)
    assert out.shape == (SEQ, BATCH, 1)
    assert hn.shape == (1, BATCH, HIDDEN) and cn.shape == (1, BATCH, HIDDEN)
    np.testing.assert_allclose(np.asarray(out), np.asarray(out_ref), atol=1e-5, rtol=1e-5)
    np.testing.assert_allclose(np.asarray(hn), np.asarray(hn_ref), atol=1e-5, rtol=1e-5)
    np.testing.assert_allclose(np.asarray(cn), np.asarray(cn_ref), atol=1e-5, rtol=1e-5)

    print("KERNEL_OK")
</pallas_src>

<mosaic_0001>
module attributes {stable_mosaic.version = 11 : i64} {
  func.func @kernel(%arg0: i32, %arg1: memref<8x2x128xf32, #tpu.memory_space<vmem>>, %arg2: memref<32x128xf32, #tpu.memory_space<vmem>>, %arg3: memref<2x32xf32, #tpu.memory_space<vmem>>, %arg4: memref<2x32xf32, #tpu.memory_space<vmem>>, %arg5: memref<8x2x32xf32, #tpu.memory_space<vmem>>, %arg6: memref<2x32xf32, #tpu.memory_space<vmem>>, %arg7: memref<2x32xf32, #tpu.memory_space<vmem>>) attributes {dimension_semantics = [#tpu.dimension_semantics<arbitrary>], iteration_bounds = array<i64: 1>, scalar_prefetch = 0 : i64, scratch_operands = 0 : i64, tpu.core_type = #tpu.core_type<tc>, window_params = [{transform_indices = @transform_0, window_bounds = array<i64: 8, 2, 128>}, {pipeline_mode = #tpu.pipeline_mode<synchronous>, transform_indices = @transform_1, window_bounds = array<i64: 32, 128>}, {pipeline_mode = #tpu.pipeline_mode<synchronous>, transform_indices = @transform_2, window_bounds = array<i64: 2, 32>}, {pipeline_mode = #tpu.pipeline_mode<synchronous>, transform_indices = @transform_3, window_bounds = array<i64: 2, 32>}, {transform_indices = @transform_4, window_bounds = array<i64: 8, 2, 32>}, {pipeline_mode = #tpu.pipeline_mode<synchronous>, transform_indices = @transform_5, window_bounds = array<i64: 2, 32>}, {pipeline_mode = #tpu.pipeline_mode<synchronous>, transform_indices = @transform_6, window_bounds = array<i64: 2, 32>}]} {
    %c0_i32 = arith.constant 0 : i32
    %0 = arith.cmpi eq, %arg0, %c0_i32 : i32
    %1 = arith.extui %0 : i1 to i32
    %c0_i32_0 = arith.constant 0 : i32
    %2 = arith.cmpi ne, %1, %c0_i32_0 : i32
    scf.if %2 {
      %c0_82 = arith.constant 0 : index
      %c0_83 = arith.constant 0 : index
      %264 = vector.load %arg3[%c0_82, %c0_83] : memref<2x32xf32, #tpu.memory_space<vmem>>, vector<2x32xf32>
      %c0_84 = arith.constant 0 : index
      %c0_85 = arith.constant 0 : index
      %265 = vector.load %arg6[%c0_84, %c0_85] : memref<2x32xf32, #tpu.memory_space<vmem>>, vector<2x32xf32>
      tpu.vector_store %arg6[%c0_84, %c0_85], %264 {strides = array<i32>} : memref<2x32xf32, #tpu.memory_space<vmem>>, vector<2x32xf32>,
      %c0_86 = arith.constant 0 : index
      %c0_87 = arith.constant 0 : index
      %266 = vector.load %arg4[%c0_86, %c0_87] : memref<2x32xf32, #tpu.memory_space<vmem>>, vector<2x32xf32>
      %c0_88 = arith.constant 0 : index
      %c0_89 = arith.constant 0 : index
      %267 = vector.load %arg7[%c0_88, %c0_89] : memref<2x32xf32, #tpu.memory_space<vmem>>, vector<2x32xf32>
      tpu.vector_store %arg7[%c0_88, %c0_89], %266 {strides = array<i32>} : memref<2x32xf32, #tpu.memory_space<vmem>>, vector<2x32xf32>,
    } else {
    }
    %c0 = arith.constant 0 : index
    %c0_1 = arith.constant 0 : index
    %3 = vector.load %arg6[%c0, %c0_1] : memref<2x32xf32, #tpu.memory_space<vmem>>, vector<2x32xf32>
    %c0_2 = arith.constant 0 : index
    %c0_3 = arith.constant 0 : index
    %4 = vector.load %arg7[%c0_2, %c0_3] : memref<2x32xf32, #tpu.memory_space<vmem>>, vector<2x32xf32>
    %c0_4 = arith.constant 0 : index
    %c0_5 = arith.constant 0 : index
    %5 = vector.load %arg2[%c0_4, %c0_5] : memref<32x128xf32, #tpu.memory_space<vmem>>, vector<32x128xf32>
    %c0_6 = arith.constant 0 : index
    %c0_7 = arith.constant 0 : index
    %c0_8 = arith.constant 0 : index
    %6 = vector.load %arg1[%c0_6, %c0_7, %c0_8] : memref<8x2x128xf32, #tpu.memory_space<vmem>>, vector<1x2x128xf32>
    %7 = vector.shape_cast %6 : vector<1x2x128xf32> to vector<2x128xf32>
    %cst = arith.constant dense<0.000000e+00> : vector<2x128xf32>
    %8 = tpu.matmul %3, %5, %cst {dimension_numbers = #tpu.dot_dimension_numbers<[1], [0], [0], [1], [0, 0, 1, 1], [], []>} : vector<2x32xf32>, vector<32x128xf32>, vector<2x128xf32> -> vector<2x128xf32>
    %9 = arith.addf %7, %8 : vector<2x128xf32>
    %10 = vector.extract_strided_slice %9 {offsets = [0, 0], sizes = [2, 32], strides = [1, 1]} : vector<2x128xf32> to vector<2x32xf32>
    %11 = arith.negf %10 : vector<2x32xf32>
    %12 = math.exp %11 : vector<2x32xf32>
    %cst_9 = arith.constant 1.000000e+00 : f32
    %13 = vector.broadcast %cst_9 : f32 to vector<2x32xf32>
    %14 = arith.addf %13, %12 : vector<2x32xf32>
    %15 = arith.divf %13, %14 : vector<2x32xf32>
    %16 = vector.extract_strided_slice %9 {offsets = [0, 32], sizes = [2, 32], strides = [1, 1]} : vector<2x128xf32> to vector<2x32xf32>
    %17 = arith.negf %16 : vector<2x32xf32>
    %18 = math.exp %17 : vector<2x32xf32>
    %cst_10 = arith.constant 1.000000e+00 : f32
    %19 = vector.broadcast %cst_10 : f32 to vector<2x32xf32>
    %20 = arith.addf %19, %18 : vector<2x32xf32>
    %21 = arith.divf %19, %20 : vector<2x32xf32>
    %22 = vector.extract_strided_slice %9 {offsets = [0, 64], sizes = [2, 32], strides = [1, 1]} : vector<2x128xf32> to vector<2x32xf32>
    %23 = math.tanh %22 : vector<2x32xf32>
    %24 = vector.extract_strided_slice %9 {offsets = [0, 96], sizes = [2, 32], strides = [1, 1]} : vector<2x128xf32> to vector<2x32xf32>
    %25 = arith.negf %24 : vector<2x32xf32>
    %26 = math.exp %25 : vector<2x32xf32>
    %cst_11 = arith.constant 1.000000e+00 : f32
    %27 = vector.broadcast %cst_11 : f32 to vector<2x32xf32>
    %28 = arith.addf %27, %26 : vector<2x32xf32>
    %29 = arith.divf %27, %28 : vector<2x32xf32>
    %30 = arith.mulf %21, %4 : vector<2x32xf32>
    %31 = arith.mulf %15, %23 : vector<2x32xf32>
    %32 = arith.addf %30, %31 : vector<2x32xf32>
    %33 = math.tanh %32 : vector<2x32xf32>
    %34 = arith.mulf %29, %33 : vector<2x32xf32>
    %c0_12 = arith.constant 0 : index
    %c0_13 = arith.constant 0 : index
    %c0_14 = arith.constant 0 : index
    %35 = vector.load %arg5[%c0_12, %c0_13, %c0_14] : memref<8x2x32xf32, #tpu.memory_space<vmem>>, vector<1x2x32xf32>
    %36 = vector.shape_cast %35 : vector<1x2x32xf32> to vector<2x32xf32>
    %37 = vector.shape_cast %34 : vector<2x32xf32> to vector<1x2x32xf32>
    tpu.vector_store %arg5[%c0_12, %c0_13, %c0_14], %37 {strides = array<i32>} : memref<8x2x32xf32, #tpu.memory_space<vmem>>, vector<1x2x32xf32>,
    %c1 = arith.constant 1 : index
    %c0_15 = arith.constant 0 : index
    %c0_16 = arith.constant 0 : index
    %38 = vector.load %arg1[%c1, %c0_15, %c0_16] : memref<8x2x128xf32, #tpu.memory_space<vmem>>, vector<1x2x128xf32>
    %39 = vector.shape_cast %38 : vector<1x2x128xf32> to vector<2x128xf32>
    %cst_17 = arith.constant dense<0.000000e+00> : vector<2x128xf32>
    %40 = tpu.matmul %34, %5, %cst_17 {dimension_numbers = #tpu.dot_dimension_numbers<[1], [0], [0], [1], [0, 0, 1, 1], [], []>} : vector<2x32xf32>, vector<32x128xf32>, vector<2x128xf32> -> vector<2x128xf32>
    %41 = arith.addf %39, %40 : vector<2x128xf32>
    %42 = vector.extract_strided_slice %41 {offsets = [0, 0], sizes = [2, 32], strides = [1, 1]} : vector<2x128xf32> to vector<2x32xf32>
    %43 = arith.negf %42 : vector<2x32xf32>
    %44 = math.exp %43 : vector<2x32xf32>
    %cst_18 = arith.constant 1.000000e+00 : f32
    %45 = vector.broadcast %cst_18 : f32 to vector<2x32xf32>
    %46 = arith.addf %45, %44 : vector<2x32xf32>
    %47 = arith.divf %45, %46 : vector<2x32xf32>
    %48 = vector.extract_strided_slice %41 {offsets = [0, 32], sizes = [2, 32], strides = [1, 1]} : vector<2x128xf32> to vector<2x32xf32>
    %49 = arith.negf %48 : vector<2x32xf32>
    %50 = math.exp %49 : vector<2x32xf32>
    %cst_19 = arith.constant 1.000000e+00 : f32
    %51 = vector.broadcast %cst_19 : f32 to vector<2x32xf32>
    %52 = arith.addf %51, %50 : vector<2x32xf32>
    %53 = arith.divf %51, %52 : vector<2x32xf32>
    %54 = vector.extract_strided_slice %41 {offsets = [0, 64], sizes = [2, 32], strides = [1, 1]} : vector<2x128xf32> to vector<2x32xf32>
    %55 = math.tanh %54 : vector<2x32xf32>
    %56 = vector.extract_strided_slice %41 {offsets = [0, 96], sizes = [2, 32], strides = [1, 1]} : vector<2x128xf32> to vector<2x32xf32>
    %57 = arith.negf %56 : vector<2x32xf32>
    %58 = math.exp %57 : vector<2x32xf32>
    %cst_20 = arith.constant 1.000000e+00 : f32
    %59 = vector.broadcast %cst_20 : f32 to vector<2x32xf32>
    %60 = arith.addf %59, %58 : vector<2x32xf32>
    %61 = arith.divf %59, %60 : vector<2x32xf32>
    %62 = arith.mulf %53, %32 : vector<2x32xf32>
    %63 = arith.mulf %47, %55 : vector<2x32xf32>
    %64 = arith.addf %62, %63 : vector<2x32xf32>
    %65 = math.tanh %64 : vector<2x32xf32>
    %66 = arith.mulf %61, %65 : vector<2x32xf32>
    %c1_21 = arith.constant 1 : index
    %c0_22 = arith.constant 0 : index
    %c0_23 = arith.constant 0 : index
    %67 = vector.load %arg5[%c1_21, %c0_22, %c0_23] : memref<8x2x32xf32, #tpu.memory_space<vmem>>, vector<1x2x32xf32>
    %68 = vector.shape_cast %67 : vector<1x2x32xf32> to vector<2x32xf32>
    %69 = vector.shape_cast %66 : vector<2x32xf32> to vector<1x2x32xf32>
    tpu.vector_store %arg5[%c1_21, %c0_22, %c0_23], %69 {strides = array<i32>} : memref<8x2x32xf32, #tpu.memory_space<vmem>>, vector<1x2x32xf32>,
    %c2 = arith.constant 2 : index
    %c0_24 = arith.constant 0 : index
    %c0_25 = arith.constant 0 : index
    %70 = vector.load %arg1[%c2, %c0_24, %c0_25] : memref<8x2x128xf32, #tpu.memory_space<vmem>>, vector<1x2x128xf32>
    %71 = vector.shape_cast %70 : vector<1x2x128xf32> to vector<2x128xf32>
    %cst_26 = arith.constant dense<0.000000e+00> : vector<2x128xf32>
    %72 = tpu.matmul %66, %5, %cst_26 {dimension_numbers = #tpu.dot_dimension_numbers<[1], [0], [0], [1], [0, 0, 1, 1], [], []>} : vector<2x32xf32>, vector<32x128xf32>, vector<2x128xf32> -> vector<2x128xf32>
    %73 = arith.addf %71, %72 : vector<2x128xf32>
    %74 = vector.extract_strided_slice %73 {offsets = [0, 0], sizes = [2, 32], strides = [1, 1]} : vector<2x128xf32> to vector<2x32xf32>
    %75 = arith.negf %74 : vector<2x32xf32>
    %76 = math.exp %75 : vector<2x32xf32>
    %cst_27 = arith.constant 1.000000e+00 : f32
    %77 = vector.broadcast %cst_27 : f32 to vector<2x32xf32>
    %78 = arith.addf %77, %76 : vector<2x32xf32>
    %79 = arith.divf %77, %78 : vector<2x32xf32>
    %80 = vector.extract_strided_slice %73 {offsets = [0, 32], sizes = [2, 32], strides = [1, 1]} : vector<2x128xf32> to vector<2x32xf32>
    %81 = arith.negf %80 : vector<2x32xf32>
    %82 = math.exp %81 : vector<2x32xf32>
    %cst_28 = arith.constant 1.000000e+00 : f32
    %83 = vector.broadcast %cst_28 : f32 to vector<2x32xf32>
    %84 = arith.addf %83, %82 : vector<2x32xf32>
    %85 = arith.divf %83, %84 : vector<2x32xf32>
    %86 = vector.extract_strided_slice %73 {offsets = [0, 64], sizes = [2, 32], strides = [1, 1]} : vector<2x128xf32> to vector<2x32xf32>
    %87 = math.tanh %86 : vector<2x32xf32>
    %88 = vector.extract_strided_slice %73 {offsets = [0, 96], sizes = [2, 32], strides = [1, 1]} : vector<2x128xf32> to vector<2x32xf32>
    %89 = arith.negf %88 : vector<2x32xf32>
    %90 = math.exp %89 : vector<2x32xf32>
    %cst_29 = arith.constant 1.000000e+00 : f32
    %91 = vector.broadcast %cst_29 : f32 to vector<2x32xf32>
    %92 = arith.addf %91, %90 : vector<2x32xf32>
    %93 = arith.divf %91, %92 : vector<2x32xf32>
    %94 = arith.mulf %85, %64 : vector<2x32xf32>
    %95 = arith.mulf %79, %87 : vector<2x32xf32>
    %96 = arith.addf %94, %95 : vector<2x32xf32>
    %97 = math.tanh %96 : vector<2x32xf32>
    %98 = arith.mulf %93, %97 : vector<2x32xf32>
    %c2_30 = arith.constant 2 : index
    %c0_31 = arith.constant 0 : index
    %c0_32 = arith.constant 0 : index
    %99 = vector.load %arg5[%c2_30, %c0_31, %c0_32] : memref<8x2x32xf32, #tpu.memory_space<vmem>>, vector<1x2x32xf32>
    %100 = vector.shape_cast %99 : vector<1x2x32xf32> to vector<2x32xf32>
    %101 = vector.shape_cast %98 : vector<2x32xf32> to vector<1x2x32xf32>
    tpu.vector_store %arg5[%c2_30, %c0_31, %c0_32], %101 {strides = array<i32>} : memref<8x2x32xf32, #tpu.memory_space<vmem>>, vector<1x2x32xf32>,
    %c3 = arith.constant 3 : index
    %c0_33 = arith.constant 0 : index
    %c0_34 = arith.constant 0 : index
    %102 = vector.load %arg1[%c3, %c0_33, %c0_34] : memref<8x2x128xf32, #tpu.memory_space<vmem>>, vector<1x2x128xf32>
    %103 = vector.shape_cast %102 : vector<1x2x128xf32> to vector<2x128xf32>
    %cst_35 = arith.constant dense<0.000000e+00> : vector<2x128xf32>
    %104 = tpu.matmul %98, %5, %cst_35 {dimension_numbers = #tpu.dot_dimension_numbers<[1], [0], [0], [1], [0, 0, 1, 1], [], []>} : vector<2x32xf32>, vector<32x128xf32>, vector<2x128xf32> -> vector<2x128xf32>
    %105 = arith.addf %103, %104 : vector<2x128xf32>
    %106 = vector.extract_strided_slice %105 {offsets = [0, 0], sizes = [2, 32], strides = [1, 1]} : vector<2x128xf32> to vector<2x32xf32>
    %107 = arith.negf %106 : vector<2x32xf32>
    %108 = math.exp %107 : vector<2x32xf32>
    %cst_36 = arith.constant 1.000000e+00 : f32
    %109 = vector.broadcast %cst_36 : f32 to vector<2x32xf32>
    %110 = arith.addf %109, %108 : vector<2x32xf32>
    %111 = arith.divf %109, %110 : vector<2x32xf32>
    %112 = vector.extract_strided_slice %105 {offsets = [0, 32], sizes = [2, 32], strides = [1, 1]} : vector<2x128xf32> to vector<2x32xf32>
    %113 = arith.negf %112 : vector<2x32xf32>
    %114 = math.exp %113 : vector<2x32xf32>
    %cst_37 = arith.constant 1.000000e+00 : f32
    %115 = vector.broadcast %cst_37 : f32 to vector<2x32xf32>
    %116 = arith.addf %115, %114 : vector<2x32xf32>
    %117 = arith.divf %115, %116 : vector<2x32xf32>
    %118 = vector.extract_strided_slice %105 {offsets = [0, 64], sizes = [2, 32], strides = [1, 1]} : vector<2x128xf32> to vector<2x32xf32>
    %119 = math.tanh %118 : vector<2x32xf32>
    %120 = vector.extract_strided_slice %105 {offsets = [0, 96], sizes = [2, 32], strides = [1, 1]} : vector<2x128xf32> to vector<2x32xf32>
    %121 = arith.negf %120 : vector<2x32xf32>
    %122 = math.exp %121 : vector<2x32xf32>
    %cst_38 = arith.constant 1.000000e+00 : f32
    %123 = vector.broadcast %cst_38 : f32 to vector<2x32xf32>
    %124 = arith.addf %123, %122 : vector<2x32xf32>
    %125 = arith.divf %123, %124 : vector<2x32xf32>
    %126 = arith.mulf %117, %96 : vector<2x32xf32>
    %127 = arith.mulf %111, %119 : vector<2x32xf32>
    %128 = arith.addf %126, %127 : vector<2x32xf32>
    %129 = math.tanh %128 : vector<2x32xf32>
    %130 = arith.mulf %125, %129 : vector<2x32xf32>
    %c3_39 = arith.constant 3 : index
    %c0_40 = arith.constant 0 : index
    %c0_41 = arith.constant 0 : index
    %131 = vector.load %arg5[%c3_39, %c0_40, %c0_41] : memref<8x2x32xf32, #tpu.memory_space<vmem>>, vector<1x2x32xf32>
    %132 = vector.shape_cast %131 : vector<1x2x32xf32> to vector<2x32xf32>
    %133 = vector.shape_cast %130 : vector<2x32xf32> to vector<1x2x32xf32>
    tpu.vector_store %arg5[%c3_39, %c0_40, %c0_41], %133 {strides = array<i32>} : memref<8x2x32xf32, #tpu.memory_space<vmem>>, vector<1x2x32xf32>,
    %c4 = arith.constant 4 : index
    %c0_42 = arith.constant 0 : index
    %c0_43 = arith.constant 0 : index
    %134 = vector.load %arg1[%c4, %c0_42, %c0_43] : memref<8x2x128xf32, #tpu.memory_space<vmem>>, vector<1x2x128xf32>
    %135 = vector.shape_cast %134 : vector<1x2x128xf32> to vector<2x128xf32>
    %cst_44 = arith.constant dense<0.000000e+00> : vector<2x128xf32>
    %136 = tpu.matmul %130, %5, %cst_44 {dimension_numbers = #tpu.dot_dimension_numbers<[1], [0], [0], [1], [0, 0, 1, 1], [], []>} : vector<2x32xf32>, vector<32x128xf32>, vector<2x128xf32> -> vector<2x128xf32>
    %137 = arith.addf %135, %136 : vector<2x128xf32>
    %138 = vector.extract_strided_slice %137 {offsets = [0, 0], sizes = [2, 32], strides = [1, 1]} : vector<2x128xf32> to vector<2x32xf32>
    %139 = arith.negf %138 : vector<2x32xf32>
    %140 = math.exp %139 : vector<2x32xf32>
    %cst_45 = arith.constant 1.000000e+00 : f32
    %141 = vector.broadcast %cst_45 : f32 to vector<2x32xf32>
    %142 = arith.addf %141, %140 : vector<2x32xf32>
    %143 = arith.divf %141, %142 : vector<2x32xf32>
    %144 = vector.extract_strided_slice %137 {offsets = [0, 32], sizes = [2, 32], strides = [1, 1]} : vector<2x128xf32> to vector<2x32xf32>
    %145 = arith.negf %144 : vector<2x32xf32>
    %146 = math.exp %145 : vector<2x32xf32>
    %cst_46 = arith.constant 1.000000e+00 : f32
    %147 = vector.broadcast %cst_46 : f32 to vector<2x32xf32>
    %148 = arith.addf %147, %146 : vector<2x32xf32>
    %149 = arith.divf %147, %148 : vector<2x32xf32>
    %150 = vector.extract_strided_slice %137 {offsets = [0, 64], sizes = [2, 32], strides = [1, 1]} : vector<2x128xf32> to vector<2x32xf32>
    %151 = math.tanh %150 : vector<2x32xf32>
    %152 = vector.extract_strided_slice %137 {offsets = [0, 96], sizes = [2, 32], strides = [1, 1]} : vector<2x128xf32> to vector<2x32xf32>
    %153 = arith.negf %152 : vector<2x32xf32>
    %154 = math.exp %153 : vector<2x32xf32>
    %cst_47 = arith.constant 1.000000e+00 : f32
    %155 = vector.broadcast %cst_47 : f32 to vector<2x32xf32>
    %156 = arith.addf %155, %154 : vector<2x32xf32>
    %157 = arith.divf %155, %156 : vector<2x32xf32>
    %158 = arith.mulf %149, %128 : vector<2x32xf32>
    %159 = arith.mulf %143, %151 : vector<2x32xf32>
    %160 = arith.addf %158, %159 : vector<2x32xf32>
    %161 = math.tanh %160 : vector<2x32xf32>
    %162 = arith.mulf %157, %161 : vector<2x32xf32>
    %c4_48 = arith.constant 4 : index
    %c0_49 = arith.constant 0 : index
    %c0_50 = arith.constant 0 : index
    %163 = vector.load %arg5[%c4_48, %c0_49, %c0_50] : memref<8x2x32xf32, #tpu.memory_space<vmem>>, vector<1x2x32xf32>
    %164 = vector.shape_cast %163 : vector<1x2x32xf32> to vector<2x32xf32>
    %165 = vector.shape_cast %162 : vector<2x32xf32> to vector<1x2x32xf32>
    tpu.vector_store %arg5[%c4_48, %c0_49, %c0_50], %165 {strides = array<i32>} : memref<8x2x32xf32, #tpu.memory_space<vmem>>, vector<1x2x32xf32>,
    %c5 = arith.constant 5 : index
    %c0_51 = arith.constant 0 : index
    %c0_52 = arith.constant 0 : index
    %166 = vector.load %arg1[%c5, %c0_51, %c0_52] : memref<8x2x128xf32, #tpu.memory_space<vmem>>, vector<1x2x128xf32>
    %167 = vector.shape_cast %166 : vector<1x2x128xf32> to vector<2x128xf32>
    %cst_53 = arith.constant dense<0.000000e+00> : vector<2x128xf32>
    %168 = tpu.matmul %162, %5, %cst_53 {dimension_numbers = #tpu.dot_dimension_numbers<[1], [0], [0], [1], [0, 0, 1, 1], [], []>} : vector<2x32xf32>, vector<32x128xf32>, vector<2x128xf32> -> vector<2x128xf32>
    %169 = arith.addf %167, %168 : vector<2x128xf32>
    %170 = vector.extract_strided_slice %169 {offsets = [0, 0], sizes = [2, 32], strides = [1, 1]} : vector<2x128xf32> to vector<2x32xf32>
    %171 = arith.negf %170 : vector<2x32xf32>
    %172 = math.exp %171 : vector<2x32xf32>
    %cst_54 = arith.constant 1.000000e+00 : f32
    %173 = vector.broadcast %cst_54 : f32 to vector<2x32xf32>
    %174 = arith.addf %173, %172 : vector<2x32xf32>
    %175 = arith.divf %173, %174 : vector<2x32xf32>
    %176 = vector.extract_strided_slice %169 {offsets = [0, 32], sizes = [2, 32], strides = [1, 1]} : vector<2x128xf32> to vector<2x32xf32>
    %177 = arith.negf %176 : vector<2x32xf32>
    %178 = math.exp %177 : vector<2x32xf32>
    %cst_55 = arith.constant 1.000000e+00 : f32
    %179 = vector.broadcast %cst_55 : f32 to vector<2x32xf32>
    %180 = arith.addf %179, %178 : vector<2x32xf32>
    %181 = arith.divf %179, %180 : vector<2x32xf32>
    %182 = vector.extract_strided_slice %169 {offsets = [0, 64], sizes = [2, 32], strides = [1, 1]} : vector<2x128xf32> to vector<2x32xf32>
    %183 = math.tanh %182 : vector<2x32xf32>
    %184 = vector.extract_strided_slice %169 {offsets = [0, 96], sizes = [2, 32], strides = [1, 1]} : vector<2x128xf32> to vector<2x32xf32>
    %185 = arith.negf %184 : vector<2x32xf32>
    %186 = math.exp %185 : vector<2x32xf32>
    %cst_56 = arith.constant 1.000000e+00 : f32
    %187 = vector.broadcast %cst_56 : f32 to vector<2x32xf32>
    %188 = arith.addf %187, %186 : vector<2x32xf32>
    %189 = arith.divf %187, %188 : vector<2x32xf32>
    %190 = arith.mulf %181, %160 : vector<2x32xf32>
    %191 = arith.mulf %175, %183 : vector<2x32xf32>
    %192 = arith.addf %190, %191 : vector<2x32xf32>
    %193 = math.tanh %192 : vector<2x32xf32>
    %194 = arith.mulf %189, %193 : vector<2x32xf32>
    %c5_57 = arith.constant 5 : index
    %c0_58 = arith.constant 0 : index
    %c0_59 = arith.constant 0 : index
    %195 = vector.load %arg5[%c5_57, %c0_58, %c0_59] : memref<8x2x32xf32, #tpu.memory_space<vmem>>, vector<1x2x32xf32>
    %196 = vector.shape_cast %195 : vector<1x2x32xf32> to vector<2x32xf32>
    %197 = vector.shape_cast %194 : vector<2x32xf32> to vector<1x2x32xf32>
    tpu.vector_store %arg5[%c5_57, %c0_58, %c0_59], %197 {strides = array<i32>} : memref<8x2x32xf32, #tpu.memory_space<vmem>>, vector<1x2x32xf32>,
    %c6 = arith.constant 6 : index
    %c0_60 = arith.constant 0 : index
    %c0_61 = arith.constant 0 : index
    %198 = vector.load %arg1[%c6, %c0_60, %c0_61] : memref<8x2x128xf32, #tpu.memory_space<vmem>>, vector<1x2x128xf32>
    %199 = vector.shape_cast %198 : vector<1x2x128xf32> to vector<2x128xf32>
    %cst_62 = arith.constant dense<0.000000e+00> : vector<2x128xf32>
    %200 = tpu.matmul %194, %5, %cst_62 {dimension_numbers = #tpu.dot_dimension_numbers<[1], [0], [0], [1], [0, 0, 1, 1], [], []>} : vector<2x32xf32>, vector<32x128xf32>, vector<2x128xf32> -> vector<2x128xf32>
    %201 = arith.addf %199, %200 : vector<2x128xf32>
    %202 = vector.extract_strided_slice %201 {offsets = [0, 0], sizes = [2, 32], strides = [1, 1]} : vector<2x128xf32> to vector<2x32xf32>
    %203 = arith.negf %202 : vector<2x32xf32>
    %204 = math.exp %203 : vector<2x32xf32>
    %cst_63 = arith.constant 1.000000e+00 : f32
    %205 = vector.broadcast %cst_63 : f32 to vector<2x32xf32>
    %206 = arith.addf %205, %204 : vector<2x32xf32>
    %207 = arith.divf %205, %206 : vector<2x32xf32>
    %208 = vector.extract_strided_slice %201 {offsets = [0, 32], sizes = [2, 32], strides = [1, 1]} : vector<2x128xf32> to vector<2x32xf32>
    %209 = arith.negf %208 : vector<2x32xf32>
    %210 = math.exp %209 : vector<2x32xf32>
    %cst_64 = arith.constant 1.000000e+00 : f32
    %211 = vector.broadcast %cst_64 : f32 to vector<2x32xf32>
    %212 = arith.addf %211, %210 : vector<2x32xf32>
    %213 = arith.divf %211, %212 : vector<2x32xf32>
    %214 = vector.extract_strided_slice %201 {offsets = [0, 64], sizes = [2, 32], strides = [1, 1]} : vector<2x128xf32> to vector<2x32xf32>
    %215 = math.tanh %214 : vector<2x32xf32>
    %216 = vector.extract_strided_slice %201 {offsets = [0, 96], sizes = [2, 32], strides = [1, 1]} : vector<2x128xf32> to vector<2x32xf32>
    %217 = arith.negf %216 : vector<2x32xf32>
    %218 = math.exp %217 : vector<2x32xf32>
    %cst_65 = arith.constant 1.000000e+00 : f32
    %219 = vector.broadcast %cst_65 : f32 to vector<2x32xf32>
    %220 = arith.addf %219, %218 : vector<2x32xf32>
    %221 = arith.divf %219, %220 : vector<2x32xf32>
    %222 = arith.mulf %213, %192 : vector<2x32xf32>
    %223 = arith.mulf %207, %215 : vector<2x32xf32>
    %224 = arith.addf %222, %223 : vector<2x32xf32>
    %225 = math.tanh %224 : vector<2x32xf32>
    %226 = arith.mulf %221, %225 : vector<2x32xf32>
    %c6_66 = arith.constant 6 : index
    %c0_67 = arith.constant 0 : index
    %c0_68 = arith.constant 0 : index
    %227 = vector.load %arg5[%c6_66, %c0_67, %c0_68] : memref<8x2x32xf32, #tpu.memory_space<vmem>>, vector<1x2x32xf32>
    %228 = vector.shape_cast %227 : vector<1x2x32xf32> to vector<2x32xf32>
    %229 = vector.shape_cast %226 : vector<2x32xf32> to vector<1x2x32xf32>
    tpu.vector_store %arg5[%c6_66, %c0_67, %c0_68], %229 {strides = array<i32>} : memref<8x2x32xf32, #tpu.memory_space<vmem>>, vector<1x2x32xf32>,
    %c7 = arith.constant 7 : index
    %c0_69 = arith.constant 0 : index
    %c0_70 = arith.constant 0 : index
    %230 = vector.load %arg1[%c7, %c0_69, %c0_70] : memref<8x2x128xf32, #tpu.memory_space<vmem>>, vector<1x2x128xf32>
    %231 = vector.shape_cast %230 : vector<1x2x128xf32> to vector<2x128xf32>
    %cst_71 = arith.constant dense<0.000000e+00> : vector<2x128xf32>
    %232 = tpu.matmul %226, %5, %cst_71 {dimension_numbers = #tpu.dot_dimension_numbers<[1], [0], [0], [1], [0, 0, 1, 1], [], []>} : vector<2x32xf32>, vector<32x128xf32>, vector<2x128xf32> -> vector<2x128xf32>
    %233 = arith.addf %231, %232 : vector<2x128xf32>
    %234 = vector.extract_strided_slice %233 {offsets = [0, 0], sizes = [2, 32], strides = [1, 1]} : vector<2x128xf32> to vector<2x32xf32>
    %235 = arith.negf %234 : vector<2x32xf32>
    %236 = math.exp %235 : vector<2x32xf32>
    %cst_72 = arith.constant 1.000000e+00 : f32
    %237 = vector.broadcast %cst_72 : f32 to vector<2x32xf32>
    %238 = arith.addf %237, %236 : vector<2x32xf32>
    %239 = arith.divf %237, %238 : vector<2x32xf32>
    %240 = vector.extract_strided_slice %233 {offsets = [0, 32], sizes = [2, 32], strides = [1, 1]} : vector<2x128xf32> to vector<2x32xf32>
    %241 = arith.negf %240 : vector<2x32xf32>
    %242 = math.exp %241 : vector<2x32xf32>
    %cst_73 = arith.constant 1.000000e+00 : f32
    %243 = vector.broadcast %cst_73 : f32 to vector<2x32xf32>
    %244 = arith.addf %243, %242 : vector<2x32xf32>
    %245 = arith.divf %243, %244 : vector<2x32xf32>
    %246 = vector.extract_strided_slice %233 {offsets = [0, 64], sizes = [2, 32], strides = [1, 1]} : vector<2x128xf32> to vector<2x32xf32>
    %247 = math.tanh %246 : vector<2x32xf32>
    %248 = vector.extract_strided_slice %233 {offsets = [0, 96], sizes = [2, 32], strides = [1, 1]} : vector<2x128xf32> to vector<2x32xf32>
    %249 = arith.negf %248 : vector<2x32xf32>
    %250 = math.exp %249 : vector<2x32xf32>
    %cst_74 = arith.constant 1.000000e+00 : f32
    %251 = vector.broadcast %cst_74 : f32 to vector<2x32xf32>
    %252 = arith.addf %251, %250 : vector<2x32xf32>
    %253 = arith.divf %251, %252 : vector<2x32xf32>
    %254 = arith.mulf %245, %224 : vector<2x32xf32>
    %255 = arith.mulf %239, %247 : vector<2x32xf32>
    %256 = arith.addf %254, %255 : vector<2x32xf32>
    %257 = math.tanh %256 : vector<2x32xf32>
    %258 = arith.mulf %253, %257 : vector<2x32xf32>
    %c7_75 = arith.constant 7 : index
    %c0_76 = arith.constant 0 : index
    %c0_77 = arith.constant 0 : index
    %259 = vector.load %arg5[%c7_75, %c0_76, %c0_77] : memref<8x2x32xf32, #tpu.memory_space<vmem>>, vector<1x2x32xf32>
    %260 = vector.shape_cast %259 : vector<1x2x32xf32> to vector<2x32xf32>
    %261 = vector.shape_cast %258 : vector<2x32xf32> to vector<1x2x32xf32>
    tpu.vector_store %arg5[%c7_75, %c0_76, %c0_77], %261 {strides = array<i32>} : memref<8x2x32xf32, #tpu.memory_space<vmem>>, vector<1x2x32xf32>,
    %c0_78 = arith.constant 0 : index
    %c0_79 = arith.constant 0 : index
    %262 = vector.load %arg6[%c0_78, %c0_79] : memref<2x32xf32, #tpu.memory_space<vmem>>, vector<2x32xf32>
    tpu.vector_store %arg6[%c0_78, %c0_79], %258 {strides = array<i32>} : memref<2x32xf32, #tpu.memory_space<vmem>>, vector<2x32xf32>,
    %c0_80 = arith.constant 0 : index
    %c0_81 = arith.constant 0 : index
    %263 = vector.load %arg7[%c0_80, %c0_81] : memref<2x32xf32, #tpu.memory_space<vmem>>, vector<2x32xf32>
    tpu.vector_store %arg7[%c0_80, %c0_81], %256 {strides = array<i32>} : memref<2x32xf32, #tpu.memory_space<vmem>>, vector<2x32xf32>,
    return
  }
  func.func @transform_0(%arg0: i32) -> (i32, i32, i32) {
    %c0_i32 = arith.constant 0 : i32
    %c0_i32_0 = arith.constant 0 : i32
    %c0_i32_1 = arith.constant 0 : i32
    return %arg0, %c0_i32, %c0_i32_0 : i32, i32, i32
  }
  func.func @transform_1(%arg0: i32) -> (i32, i32) {
    %c0_i32 = arith.constant 0 : i32
    %c0_i32_0 = arith.constant 0 : i32
    %c0_i32_1 = arith.constant 0 : i32
    return %c0_i32, %c0_i32_0 : i32, i32
  }
  func.func @transform_2(%arg0: i32) -> (i32, i32) {
    %c0_i32 = arith.constant 0 : i32
    %c0_i32_0 = arith.constant 0 : i32
    %c0_i32_1 = arith.constant 0 : i32
    return %c0_i32, %c0_i32_0 : i32, i32
  }
  func.func @transform_3(%arg0: i32) -> (i32, i32) {
    %c0_i32 = arith.constant 0 : i32
    %c0_i32_0 = arith.constant 0 : i32
    %c0_i32_1 = arith.constant 0 : i32
    return %c0_i32, %c0_i32_0 : i32, i32
  }
  func.func @transform_4(%arg0: i32) -> (i32, i32, i32) {
    %c0_i32 = arith.constant 0 : i32
    %c0_i32_0 = arith.constant 0 : i32
    %c0_i32_1 = arith.constant 0 : i32
    return %arg0, %c0_i32, %c0_i32_0 : i32, i32, i32
  }
  func.func @transform_5(%arg0: i32) -> (i32, i32) {
    %c0_i32 = arith.constant 0 : i32
    %c0_i32_0 = arith.constant 0 : i32
    %c0_i32_1 = arith.constant 0 : i32
    return %c0_i32, %c0_i32_0 : i32, i32
  }
  func.func @transform_6(%arg0: i32) -> (i32, i32) {
    %c0_i32 = arith.constant 0 : i32
    %c0_i32_0 = arith.constant 0 : i32
    %c0_i32_1 = arith.constant 0 : i32
    return %c0_i32, %c0_i32_0 : i32, i32
  }
}

</mosaic_0001>

<bundles_post_ra>
// kernel: tpu_custom_call.1
= control target key start
LH: loop header
LB: loop body
LE: loop exit
PB: predicated region body
PF: predicated region fallthrough
CT: control target
= control target key end

     0   :  { %12 = vsyncpa [#allocation3], 0  ;;  %s1506_s0 = inlined_call_operand.hbm [shape: f32[8,2,128], index: 0, kind: input, shape index: {}]   ;;  %s1507_s1 = inlined_call_operand.hbm [shape: f32[32,128], index: 1, kind: input, shape index: {}]   ;;  %s1508_s2 = inlined_call_operand.vmem [shape: f32[2,32], index: 2, kind: input, shape index: {}]   ;;  %s1509_s3 = inlined_call_operand.vmem [shape: f32[2,32], index: 3, kind: input, shape index: {}]   ;;  %s1510_s4 = inlined_call_operand.hbm [shape: f32[8,2,32], index: 4, kind: output, shape index: {0}]   ;;  %s1511_s5 = inlined_call_operand.hbm [shape: f32[2,32], index: 5, kind: output, shape index: {1}]   ;;  %s1512_s6 = inlined_call_operand.hbm [shape: f32[2,32], index: 6, kind: output, shape index: {2}]  }
   0x1   :  { %13 = vsyncpa [#allocation6], 0 }
   0x2   :  { %14 = vsyncpa [#allocation4], 0 }
   0x3   :  { %15 = vsyncpa [#allocation9], 0  ;;  %s1290_s21 = smov [#allocation2]  }
   0x4   :  { %s21_s22 = sshll.u32 %s1290_s21, 4  ;;  %s22_s22 = int_to_ptr.vmem [resolvable:$true] %s21_s22 }
   0x5   :  { %s1190_s23 = scalar_lea.vmem %s22_s22, 256  ;;  %p1195_p1 = scmp.lt.s32.totalorder %s22_s22, %s22_s22 }
   0x6   :  { %p1191_p0 = scmp.ne.s32.totalorder %s22_s22, %s1190_s23  ;;  %p1196_p2 = scmp.lt.s32.totalorder %s1190_s23, %s1190_s23 }
   0x8   :  { %p1197_p3 = por %p1196_p2, %p1195_p1 }
   0xa   :  { %p1198_p4 = pnand %p1197_p3, %p1191_p0 }
   0xc   :  { %1201 = shalt.err (!%p1198_p4)
}
   0xd   :  { %s1291_s24 = smov 32   ;;  %s1292_s25 = smov 2  }
   0xe   :  { %27 = dma.hbm_to_vmem [thread:$0]  %s1506_s0, 256, %s22_s22, [#allocation3], %s1291_s24, %s1291_s24, %s1292_s25  }
   0xf   :  { %s1293_s28 = smov [#allocation5]  }
  0x10   :  { %s33_s29 = sshll.u32 %s1293_s28, 4  ;;  %s34_s29 = int_to_ptr.vmem [resolvable:$true] %s33_s29 }
  0x11   :  { %s1210_s30 = scalar_lea.vmem %s34_s29, 512  ;;  %p1215_p6 = scmp.lt.s32.totalorder %s34_s29, %s34_s29 }
  0x12   :  { %p1211_p5 = scmp.ne.s32.totalorder %s34_s29, %s1210_s30  ;;  %p1216_p7 = scmp.lt.s32.totalorder %s1210_s30, %s1210_s30 }
  0x14   :  { %p1217_p8 = por %p1216_p7, %p1215_p6 }
  0x16   :  { %p1218_p9 = pnand %p1217_p8, %p1211_p5 }
  0x18   :  { %1221 = shalt.err (!%p1218_p9)
}
  0x19   :  { %s1294_s7 = smov 128   ;;  %s1295_s8 = smov 8  }
  0x1a   :  { %39 = dma.hbm_to_vmem [thread:$0]  %s1507_s1, 512, %s34_s29, [#allocation6], %s1294_s7, %s1294_s7, %s1295_s8  }
  0x1b   :  { %1282 = dma.done.wait [#allocation3], 256  }
  0x1c   :  { %1283 = vsyncadd [#allocation3], 4294967040 }
  0x1d   :  { %1284 = dma.done.wait [#allocation6], 512  }
  0x1e   :  { %1285 = vsyncadd [#allocation6], 4294966784  ;;  %v1296_v0 = vmov 0.0   ;;  %vm1297_vm0 = vmmov 0   ;;  %vm55_vm1 = vcmask 254976   ;;  %v1353_v1 = vld [vmem:[#allocation5 + $0x18] sm:$0xff] }
  0x1f   :  { %1017 = vmatprep.subr.mxu0 %v1296_v0  ;;  %1025 = vmatprep.mubr.msk.f32.mxu0 %vm1297_vm0, %v1296_v0  ;;  %v1355_v2 = vld [vmem:[#allocation5 + $0x10] sm:$0xff]  ;;  %v1363_v4 = vld [vmem:[#allocation5 + $0x8] sm:$0xff]  ;;  %v1370_v5 = vld [vmem:[#allocation5] sm:$0xff]  ;;  %vm66_vm2 = vcmask 261120   ;;  %s1298_s12 = smov 64   ;;  %s1300_s13 = smov [#allocation8]  }
  0x20   :  { %1028 = vmatprep.subr.mxu1 %v1296_v0  ;;  %1036 = vmatprep.mubr.msk.f32.mxu1 %vm1297_vm0, %v1296_v0  ;;  %v54_v3 = vld [vmem:[%s1508_s2] sm:$0x3]  ;;  %v176_v28 = vld [vmem:[#allocation2 + $0x2] sm:$0x3]  ;;  %v281_v46 = vld [vmem:[#allocation2 + $0x4] sm:$0x3] }
  0x21   :  { %1018 = vmatpush3.msra.mxu0 %v1353_v1  ;;  %1029 = vmatpush3.msra.mxu1 %v1353_v1  ;;  %56 = vst.msk [vmem:[#allocation8] sm:$0x3] %vm55_vm1, %v54_v3  ;;  %v57_v7 = vld [vmem:[%s1509_s3] sm:$0x3]  ;;  %v386_v3 = vld [vmem:[#allocation2 + $0x6] sm:$0x3] }
  0x22   :  { %1019 = vmatprep.subr.mxu0 %v1296_v0  ;;  %1030 = vmatprep.subr.mxu1 %v1296_v0  ;;  %58 = vst.msk [vmem:[#allocation10] sm:$0x3] %vm55_vm1, %v57_v7  ;;  %v65_v8 = vld [vmem:[#allocation2] sm:$0x3]  ;;  %s1299_s3 = smov 96   ;;  %s934_s14 = sshll.u32 %s1300_s13, 4  ;;  %s935_s14 = int_to_ptr.vmem [resolvable:$true] %s934_s14 }
  0x23   :  { %1020 = vmatpush3.msra.mxu0 %v1355_v2  ;;  %1031 = vmatpush3.msra.mxu1 %v1355_v2  ;;  %s1301_s15 = smov [#allocation7]   ;;  %s1302_s17 = smov [#allocation10]  }
  0x24   :  { %1021 = vmatprep.subr.mxu0 %v1296_v0  ;;  %1032 = vmatprep.subr.mxu1 %v1296_v0  ;;  %s921_s16 = sshll.u32 %s1301_s15, 4  ;;  %s944_s18 = sshll.u32 %s1302_s17, 4  ;;  %s922_s16 = int_to_ptr.vmem [resolvable:$true] %s921_s16  ;;  %s945_s18 = int_to_ptr.vmem [resolvable:$true] %s944_s18 }
  0x25   :  { %1022 = vmatpush3.msra.mxu0 %v1363_v4  ;;  %1033 = vmatpush3.msra.mxu1 %v1363_v4  ;;  %s1222_s19 = scalar_lea.vmem %s935_s14, 32  ;;  %p1227_p11 = scmp.lt.s32.totalorder %s935_s14, %s935_s14 }
  0x26   :  { %1023 = vmatprep.subr.mxu0 %v1296_v0  ;;  %1034 = vmatprep.subr.mxu1 %v1296_v0  ;;  %p1223_p10 = scmp.ne.s32.totalorder %s935_s14, %s1222_s19  ;;  %p1228_p12 = scmp.lt.s32.totalorder %s1222_s19, %s1222_s19 }
  0x27   :  { %1024 = vmatpush3.msra.mxu0 %v1370_v5  ;;  %1035 = vmatpush3.msra.mxu1 %v1370_v5 }
  0x28   :  { %1039 = vmatprep.subr.mxu0 %v1296_v0  ;;  %1050 = vmatprep.subr.mxu1 %v1296_v0  ;;  %v59_v6 = vld [vmem:[#allocation8] sm:$0x3]  ;;  %p1229_p13 = por %p1228_p12, %p1227_p11 }
  0x29   :  { %1026 = vmatmul.mubr.msk.f32.vlgmr.msra.gmra.mxu0 %vm66_vm2, %v59_v6  ;;  %v60_v13 = vld [vmem:[#allocation10] sm:$0x3] }
  0x2a   :  { %1040 = vmatpush3.msra.mxu0 %v1353_v1  ;;  %1047 = vmatprep.mubr.msk.f32.mxu0 %vm1297_vm0, %v1296_v0  ;;  %p1230_p0 = pnand %p1229_p13, %p1223_p10 }
  0x2b   :  { %1041 = vmatprep.subr.mxu0 %v1296_v0 }
  0x2c   :  { %1042 = vmatpush3.msra.mxu0 %v1355_v2 }
  0x2d   :  { %1043 = vmatprep.subr.mxu0 %v1296_v0 }
  0x2e   :  { %1044 = vmatpush3.msra.mxu0 %v1363_v4 }
  0x2f   :  { %1045 = vmatprep.subr.mxu0 %v1296_v0 }
  0x30   :  { %1046 = vmatpush3.msra.mxu0 %v1370_v5 }
  0x31   :  { %1061 = vmatprep.subr.mxu0 %v1296_v0 }
  0xe9   :  { %v136_v9 = vpop.f32.mrf.mxu0 }
  0xea   :  { %v140_v10 = vadd.f32 %v136_v9, %v65_v8 }
  0xeb   :  { %v1027_v11 = vpop.f32.mrf.mxu0 }
  0xec   :  { %1118 = vtanh.f32 %v140_v10  ;;  %v962_v14 = vmul.f32 -1.442695, %v140_v10 }
  0xee   :  { %1120 = vpow2.f32 %v962_v14 }
  0xf9   :  { %v1119_v12 = vpop.eup %1118 }
  0xfa   :  { %154 = vrot.lane.b32.xlu0 %v1119_v12, %s1298_s12 }
  0xfb   :  { %v1121_v15 = vpop.eup %1120 }
  0xfc   :  { %v144_v16 = vadd.f32 1.0, %v1121_v15 }
  0xfe   :  { %149 = vrot.lane.b32.xlu0 %v60_v13, %s1291_s24  ;;  %1122 = vrcp.f32 %v144_v16 }
 0x10b   :  { %v1123_v17 = vpop.eup %1122 }
 0x16c   :  { %v155_v18 = vpop.permute.xlu0 %154 }
 0x16d   :  { %v157_v19 = vmul.f32 %v1123_v17, %v155_v18 }
 0x16f   :  { %159 = vrot.lane.b32.xlu1 %v157_v19, %s1291_s24 }
 0x170   :  { %v150_v20 = vpop.permute.xlu0 %149 }
 0x171   :  { %v152_v21 = vmul.f32 %v1123_v17, %v150_v20 }
 0x1e1   :  { %v160_v22 = vpop.permute.xlu1 %159 }
 0x1e2   :  { %v162_v23 = vadd.f32 %v160_v22, %v152_v21 }
 0x1e4   :  { %1124 = vtanh.f32 %v162_v23 }
 0x1f1   :  { %v1125_v24 = vpop.eup %1124 }
 0x1f2   :  { %165 = vrot.lane.b32.xlu1 %v1125_v24, %s1298_s12 }
 0x264   :  { %v166_v25 = vpop.permute.xlu1 %165 }
 0x265   :  { %v168_v26 = vmul.f32 %v1123_v17, %v166_v25 }
 0x267   :  { %170 = vrot.lane.b32.xlu0 %v168_v26, %s1291_s24 }
 0x2d9   :  { %v171_v27 = vpop.permute.xlu0 %170 }
 0x2da   :  { %174 = vst.msk [vmem:[#allocation7] sm:$0x3] %vm55_vm1, %v171_v27  ;;  %1037 = vmatmul.mubr.msk.f32.vlgmr.msra.gmra.mxu1 %vm66_vm2, %v171_v27 }
 0x2db   :  { %1051 = vmatpush3.msra.mxu1 %v1353_v1  ;;  %1058 = vmatprep.mubr.msk.f32.mxu1 %vm1297_vm0, %v1296_v0 }
 0x2dc   :  { %1052 = vmatprep.subr.mxu1 %v1296_v0 }
 0x2dd   :  { %1053 = vmatpush3.msra.mxu1 %v1355_v2 }
 0x2de   :  { %1054 = vmatprep.subr.mxu1 %v1296_v0 }
 0x2df   :  { %1055 = vmatpush3.msra.mxu1 %v1363_v4 }
 0x2e0   :  { %1056 = vmatprep.subr.mxu1 %v1296_v0 }
 0x2e1   :  { %1057 = vmatpush3.msra.mxu1 %v1370_v5 }
 0x2e2   :  { %1072 = vmatprep.subr.mxu1 %v1296_v0 }
 0x39a   :  { %v245_v29 = vpop.f32.mrf.mxu1 }
 0x39b   :  { %v249_v30 = vadd.f32 %v245_v29, %v176_v28 }
 0x39c   :  { %v1038_v31 = vpop.f32.mrf.mxu1 }
 0x39d   :  { %1126 = vtanh.f32 %v249_v30  ;;  %v964_v33 = vmul.f32 -1.442695, %v249_v30 }
 0x39f   :  { %1128 = vpow2.f32 %v964_v33 }
 0x3aa   :  { %v1127_v32 = vpop.eup %1126 }
 0x3ab   :  { %259 = vrot.lane.b32.xlu1 %v1127_v32, %s1298_s12 }
 0x3ac   :  { %v1129_v34 = vpop.eup %1128 }
 0x3ad   :  { %v253_v35 = vadd.f32 1.0, %v1129_v34 }
 0x3af   :  { %1130 = vrcp.f32 %v253_v35 }
 0x3bc   :  { %v1131_v36 = vpop.eup %1130 }
 0x3bd   :  { %v257_v39 = vmul.f32 %v1131_v36, %v162_v23  ;;  %v491_v23 = vld [vmem:[#allocation2 + $0x8] sm:$0x3] }
 0x41d   :  { %v260_v37 = vpop.permute.xlu1 %259 }
 0x41e   :  { %v262_v38 = vmul.f32 %v1131_v36, %v260_v37 }
 0x420   :  { %264 = vrot.lane.b32.xlu0 %v262_v38, %s1291_s24 }
 0x492   :  { %v265_v40 = vpop.permute.xlu0 %264 }
 0x493   :  { %v267_v41 = vadd.f32 %v265_v40, %v257_v39 }
 0x495   :  { %1132 = vtanh.f32 %v267_v41 }
 0x4a2   :  { %v1133_v42 = vpop.eup %1132 }
 0x4a3   :  { %270 = vrot.lane.b32.xlu1 %v1133_v42, %s1298_s12 }
 0x515   :  { %v271_v43 = vpop.permute.xlu1 %270 }
 0x516   :  { %v273_v44 = vmul.f32 %v1131_v36, %v271_v43 }
 0x518   :  { %275 = vrot.lane.b32.xlu0 %v273_v44, %s1291_s24 }
 0x58a   :  { %v276_v45 = vpop.permute.xlu0 %275 }
 0x58b   :  { %279 = vst.msk [vmem:[#allocation7 + $0x2] sm:$0x3] %vm55_vm1, %v276_v45  ;;  %1048 = vmatmul.mubr.msk.f32.vlgmr.msra.gmra.mxu0 %vm66_vm2, %v276_v45 }
 0x58c   :  { %1062 = vmatpush3.msra.mxu0 %v1353_v1  ;;  %1069 = vmatprep.mubr.msk.f32.mxu0 %vm1297_vm0, %v1296_v0 }
 0x58d   :  { %1063 = vmatprep.subr.mxu0 %v1296_v0 }
 0x58e   :  { %1064 = vmatpush3.msra.mxu0 %v1355_v2 }
 0x58f   :  { %1065 = vmatprep.subr.mxu0 %v1296_v0 }
 0x590   :  { %1066 = vmatpush3.msra.mxu0 %v1363_v4 }
 0x591   :  { %1067 = vmatprep.subr.mxu0 %v1296_v0 }
 0x592   :  { %1068 = vmatpush3.msra.mxu0 %v1370_v5 }
 0x593   :  { %1083 = vmatprep.subr.mxu0 %v1296_v0 }
 0x64b   :  { %v350_v47 = vpop.f32.mrf.mxu0 }
 0x64c   :  { %v354_v48 = vadd.f32 %v350_v47, %v281_v46 }
 0x64d   :  { %v1049_v49 = vpop.f32.mrf.mxu0 }
 0x64e   :  { %1134 = vtanh.f32 %v354_v48  ;;  %v966_v51 = vmul.f32 -1.442695, %v354_v48 }
 0x650   :  { %1136 = vpow2.f32 %v966_v51 }
 0x65b   :  { %v1135_v50 = vpop.eup %1134 }
 0x65c   :  { %364 = vrot.lane.b32.xlu1 %v1135_v50, %s1298_s12 }
 0x65d   :  { %v1137_v52 = vpop.eup %1136 }
 0x65e   :  { %v358_v53 = vadd.f32 1.0, %v1137_v52 }
 0x660   :  { %1138 = vrcp.f32 %v358_v53 }
 0x66d   :  { %v1139_v54 = vpop.eup %1138 }
 0x66e   :  { %v362_v57 = vmul.f32 %v1139_v54, %v267_v41  ;;  %v596_v41 = vld [vmem:[#allocation2 + $0xa] sm:$0x3] }
 0x6ce   :  { %v365_v55 = vpop.permute.xlu1 %364 }
 0x6cf   :  { %v367_v56 = vmul.f32 %v1139_v54, %v365_v55 }
 0x6d1   :  { %369 = vrot.lane.b32.xlu0 %v367_v56, %s1291_s24 }
 0x743   :  { %v370_v58 = vpop.permute.xlu0 %369 }
 0x744   :  { %v372_v59 = vadd.f32 %v370_v58, %v362_v57 }
 0x746   :  { %1140 = vtanh.f32 %v372_v59 }
 0x753   :  { %v1141_v60 = vpop.eup %1140 }
 0x754   :  { %375 = vrot.lane.b32.xlu1 %v1141_v60, %s1298_s12 }
 0x7c6   :  { %v376_v61 = vpop.permute.xlu1 %375 }
 0x7c7   :  { %v378_v62 = vmul.f32 %v1139_v54, %v376_v61  ;;  %v701_v54 = vld [vmem:[#allocation2 + $0xc] sm:$0x3] }
 0x7c9   :  { %380 = vrot.lane.b32.xlu0 %v378_v62, %s1291_s24 }
 0x83b   :  { %v381_v63 = vpop.permute.xlu0 %380 }
 0x83c   :  { %384 = vst.msk [vmem:[#allocation7 + $0x4] sm:$0x3] %vm55_vm1, %v381_v63  ;;  %1059 = vmatmul.mubr.msk.f32.vlgmr.msra.gmra.mxu1 %vm66_vm2, %v381_v63 }
 0x83d   :  { %1073 = vmatpush3.msra.mxu1 %v1353_v1  ;;  %1080 = vmatprep.mubr.msk.f32.mxu1 %vm1297_vm0, %v1296_v0 }
 0x83e   :  { %1074 = vmatprep.subr.mxu1 %v1296_v0 }
 0x83f   :  { %1075 = vmatpush3.msra.mxu1 %v1355_v2 }
 0x840   :  { %1076 = vmatprep.subr.mxu1 %v1296_v0 }
 0x841   :  { %1077 = vmatpush3.msra.mxu1 %v1363_v4 }
 0x842   :  { %1078 = vmatprep.subr.mxu1 %v1296_v0 }
 0x843   :  { %1079 = vmatpush3.msra.mxu1 %v1370_v5 }
 0x844   :  { %1094 = vmatprep.subr.mxu1 %v1296_v0 }
 0x8fc   :  { %v455_v6 = vpop.f32.mrf.mxu1 }
 0x8fd   :  { %v459_v7 = vadd.f32 %v455_v6, %v386_v3 }
 0x8fe   :  { %v1060_v8 = vpop.f32.mrf.mxu1 }
 0x8ff   :  { %1142 = vtanh.f32 %v459_v7  ;;  %v968_v10 = vmul.f32 -1.442695, %v459_v7 }
 0x901   :  { %1144 = vpow2.f32 %v968_v10 }
 0x90c   :  { %v1143_v9 = vpop.eup %1142 }
 0x90d   :  { %469 = vrot.lane.b32.xlu1 %v1143_v9, %s1298_s12 }
 0x90e   :  { %v1145_v11 = vpop.eup %1144 }
 0x90f   :  { %v463_v12 = vadd.f32 1.0, %v1145_v11 }
 0x911   :  { %1146 = vrcp.f32 %v463_v12 }
 0x91e   :  { %v1147_v13 = vpop.eup %1146 }
 0x91f   :  { %v467_v16 = vmul.f32 %v1147_v13, %v372_v59 }
 0x97f   :  { %v470_v14 = vpop.permute.xlu1 %469 }
 0x980   :  { %v472_v15 = vmul.f32 %v1147_v13, %v470_v14 }
 0x982   :  { %474 = vrot.lane.b32.xlu0 %v472_v15, %s1291_s24 }
 0x9f4   :  { %v475_v17 = vpop.permute.xlu0 %474 }
 0x9f5   :  { %v477_v18 = vadd.f32 %v475_v17, %v467_v16 }
 0x9f7   :  { %1148 = vtanh.f32 %v477_v18 }
 0xa04   :  { %v1149_v19 = vpop.eup %1148 }
 0xa05   :  { %480 = vrot.lane.b32.xlu1 %v1149_v19, %s1298_s12 }
 0xa77   :  { %v481_v20 = vpop.permute.xlu1 %480 }
 0xa78   :  { %v483_v21 = vmul.f32 %v1147_v13, %v481_v20  ;;  %v806_v13 = vld [vmem:[#allocation2 + $0xe] sm:$0x3] }
 0xa7a   :  { %485 = vrot.lane.b32.xlu0 %v483_v21, %s1291_s24 }
 0xaec   :  { %v486_v22 = vpop.permute.xlu0 %485 }
 0xaed   :  { %489 = vst.msk [vmem:[#allocation7 + $0x6] sm:$0x3] %vm55_vm1, %v486_v22  ;;  %1070 = vmatmul.mubr.msk.f32.vlgmr.msra.gmra.mxu0 %vm66_vm2, %v486_v22 }
 0xaee   :  { %1084 = vmatpush3.msra.mxu0 %v1353_v1  ;;  %1091 = vmatprep.mubr.msk.f32.mxu0 %vm1297_vm0, %v1296_v0 }
 0xaef   :  { %1085 = vmatprep.subr.mxu0 %v1296_v0 }
 0xaf0   :  { %1086 = vmatpush3.msra.mxu0 %v1355_v2 }
 0xaf1   :  { %1087 = vmatprep.subr.mxu0 %v1296_v0 }
 0xaf2   :  { %1088 = vmatpush3.msra.mxu0 %v1363_v4 }
 0xaf3   :  { %1089 = vmatprep.subr.mxu0 %v1296_v0 }
 0xaf4   :  { %1090 = vmatpush3.msra.mxu0 %v1370_v5 }
 0xbad   :  { %v560_v24 = vpop.f32.mrf.mxu0 }
 0xbae   :  { %v564_v25 = vadd.f32 %v560_v24, %v491_v23 }
 0xbaf   :  { %v1071_v26 = vpop.f32.mrf.mxu0 }
 0xbb0   :  { %1150 = vtanh.f32 %v564_v25  ;;  %v970_v28 = vmul.f32 -1.442695, %v564_v25 }
 0xbb2   :  { %1152 = vpow2.f32 %v970_v28 }
 0xbbd   :  { %v1151_v27 = vpop.eup %1150 }
 0xbbe   :  { %574 = vrot.lane.b32.xlu1 %v1151_v27, %s1298_s12 }
 0xbbf   :  { %v1153_v29 = vpop.eup %1152 }
 0xbc0   :  { %v568_v30 = vadd.f32 1.0, %v1153_v29 }
 0xbc2   :  { %1154 = vrcp.f32 %v568_v30 }
 0xbcf   :  { %v1155_v31 = vpop.eup %1154 }
 0xbd0   :  { %v572_v34 = vmul.f32 %v1155_v31, %v477_v18 }
 0xc30   :  { %v575_v32 = vpop.permute.xlu1 %574 }
 0xc31   :  { %v577_v33 = vmul.f32 %v1155_v31, %v575_v32 }
 0xc33   :  { %579 = vrot.lane.b32.xlu0 %v577_v33, %s1291_s24 }
 0xca5   :  { %v580_v35 = vpop.permute.xlu0 %579 }
 0xca6   :  { %v582_v36 = vadd.f32 %v580_v35, %v572_v34 }
 0xca8   :  { %1156 = vtanh.f32 %v582_v36 }
 0xcb5   :  { %v1157_v37 = vpop.eup %1156 }
 0xcb6   :  { %585 = vrot.lane.b32.xlu1 %v1157_v37, %s1298_s12 }
 0xd28   :  { %v586_v38 = vpop.permute.xlu1 %585 }
 0xd29   :  { %v588_v39 = vmul.f32 %v1155_v31, %v586_v38 }
 0xd2b   :  { %590 = vrot.lane.b32.xlu0 %v588_v39, %s1291_s24 }
 0xd9d   :  { %v591_v40 = vpop.permute.xlu0 %590 }
 0xd9e   :  { %594 = vst.msk [vmem:[#allocation7 + $0x8] sm:$0x3] %vm55_vm1, %v591_v40  ;;  %1081 = vmatmul.mubr.msk.f32.vlgmr.msra.gmra.mxu1 %vm66_vm2, %v591_v40 }
 0xd9f   :  { %1095 = vmatpush3.msra.mxu1 %v1353_v1  ;;  %1102 = vmatprep.mubr.msk.f32.mxu1 %vm1297_vm0, %v1296_v0 }
 0xda0   :  { %1096 = vmatprep.subr.mxu1 %v1296_v0 }
 0xda1   :  { %1097 = vmatpush3.msra.mxu1 %v1355_v2 }
 0xda2   :  { %1098 = vmatprep.subr.mxu1 %v1296_v0 }
 0xda3   :  { %1099 = vmatpush3.msra.mxu1 %v1363_v4 }
 0xda4   :  { %1100 = vmatprep.subr.mxu1 %v1296_v0 }
 0xda5   :  { %1101 = vmatpush3.msra.mxu1 %v1370_v5 }
 0xe5e   :  { %v665_v42 = vpop.f32.mrf.mxu1 }
 0xe5f   :  { %v669_v43 = vadd.f32 %v665_v42, %v596_v41 }
 0xe60   :  { %v1082_v44 = vpop.f32.mrf.mxu1 }
 0xe61   :  { %1158 = vtanh.f32 %v669_v43  ;;  %v972_v45 = vmul.f32 -1.442695, %v669_v43 }
 0xe63   :  { %1160 = vpow2.f32 %v972_v45 }
 0xe6e   :  { %v1159_v1 = vpop.eup %1158 }
 0xe6f   :  { %679 = vrot.lane.b32.xlu1 %v1159_v1, %s1298_s12 }
 0xe70   :  { %v1161_v46 = vpop.eup %1160 }
 0xe71   :  { %v673_v2 = vadd.f32 1.0, %v1161_v46 }
 0xe73   :  { %1162 = vrcp.f32 %v673_v2 }
 0xe80   :  { %v1163_v47 = vpop.eup %1162 }
 0xe81   :  { %v677_v0 = vmul.f32 %v1163_v47, %v582_v36 }
 0xee1   :  { %v680_v48 = vpop.permute.xlu1 %679 }
 0xee2   :  { %v682_v4 = vmul.f32 %v1163_v47, %v680_v48 }
 0xee4   :  { %684 = vrot.lane.b32.xlu0 %v682_v4, %s1291_s24 }
 0xf56   :  { %v685_v5 = vpop.permute.xlu0 %684 }
 0xf57   :  { %v687_v49 = vadd.f32 %v685_v5, %v677_v0 }
 0xf59   :  { %1164 = vtanh.f32 %v687_v49 }
 0xf66   :  { %v1165_v50 = vpop.eup %1164 }
 0xf67   :  { %690 = vrot.lane.b32.xlu1 %v1165_v50, %s1298_s12 }
 0xfd9   :  { %v691_v51 = vpop.permute.xlu1 %690 }
 0xfda   :  { %v693_v52 = vmul.f32 %v1163_v47, %v691_v51 }
 0xfdc   :  { %695 = vrot.lane.b32.xlu0 %v693_v52, %s1291_s24 }
0x104e   :  { %v696_v53 = vpop.permute.xlu0 %695 }
0x104f   :  { %699 = vst.msk [vmem:[#allocation7 + $0xa] sm:$0x3] %vm55_vm1, %v696_v53  ;;  %1092 = vmatmul.mubr.msk.f32.vlgmr.msra.gmra.mxu0 %vm66_vm2, %v696_v53 }
0x110f   :  { %v770_v55 = vpop.f32.mrf.mxu0 }
0x1110   :  { %v774_v56 = vadd.f32 %v770_v55, %v701_v54 }
0x1111   :  { %v1093_v57 = vpop.f32.mrf.mxu0 }
0x1112   :  { %1166 = vtanh.f32 %v774_v56  ;;  %v974_v59 = vmul.f32 -1.442695, %v774_v56 }
0x1114   :  { %1168 = vpow2.f32 %v974_v59 }
0x111f   :  { %v1167_v58 = vpop.eup %1166 }
0x1120   :  { %784 = vrot.lane.b32.xlu1 %v1167_v58, %s1298_s12 }
0x1121   :  { %v1169_v60 = vpop.eup %1168 }
0x1122   :  { %v778_v61 = vadd.f32 1.0, %v1169_v60 }
0x1124   :  { %1170 = vrcp.f32 %v778_v61 }
0x1131   :  { %v1171_v62 = vpop.eup %1170 }
0x1132   :  { %v782_v6 = vmul.f32 %v1171_v62, %v687_v49 }
0x1192   :  { %v785_v63 = vpop.permute.xlu1 %784 }
0x1193   :  { %v787_v3 = vmul.f32 %v1171_v62, %v785_v63 }
0x1195   :  { %789 = vrot.lane.b32.xlu0 %v787_v3, %s1291_s24 }
0x1207   :  { %v790_v7 = vpop.permute.xlu0 %789 }
0x1208   :  { %v792_v8 = vadd.f32 %v790_v7, %v782_v6 }
0x120a   :  { %1172 = vtanh.f32 %v792_v8 }
0x1217   :  { %v1173_v9 = vpop.eup %1172 }
0x1218   :  { %795 = vrot.lane.b32.xlu1 %v1173_v9, %s1298_s12 }
0x128a   :  { %v796_v10 = vpop.permute.xlu1 %795 }
0x128b   :  { %v798_v11 = vmul.f32 %v1171_v62, %v796_v10 }
0x128d   :  { %800 = vrot.lane.b32.xlu0 %v798_v11, %s1291_s24 }
0x12ff   :  { %v801_v12 = vpop.permute.xlu0 %800 }
0x1300   :  { %804 = vst.msk [vmem:[#allocation7 + $0xc] sm:$0x3] %vm55_vm1, %v801_v12  ;;  %1103 = vmatmul.mubr.msk.f32.vlgmr.msra.gmra.mxu1 %vm66_vm2, %v801_v12 }
0x13c0   :  { %v875_v14 = vpop.f32.mrf.mxu1 }
0x13c1   :  { %v879_v15 = vadd.f32 %v875_v14, %v806_v13 }
0x13c2   :  { %v1104_v16 = vpop.f32.mrf.mxu1 }
0x13c3   :  { %1174 = vtanh.f32 %v879_v15  ;;  %v976_v18 = vmul.f32 -1.442695, %v879_v15 }
0x13c5   :  { %1176 = vpow2.f32 %v976_v18 }
0x13d0   :  { %v1175_v17 = vpop.eup %1174 }
0x13d1   :  { %889 = vrot.lane.b32.xlu1 %v1175_v17, %s1298_s12 }
0x13d2   :  { %v1177_v19 = vpop.eup %1176 }
0x13d3   :  { %v883_v20 = vadd.f32 1.0, %v1177_v19 }
0x13d5   :  { %1178 = vrcp.f32 %v883_v20 }
0x13e2   :  { %v1179_v21 = vpop.eup %1178 }
0x13e3   :  { %v887_v24 = vmul.f32 %v1179_v21, %v792_v8 }
0x1443   :  { %v890_v22 = vpop.permute.xlu1 %889 }
0x1444   :  { %v892_v23 = vmul.f32 %v1179_v21, %v890_v22 }
0x1446   :  { %894 = vrot.lane.b32.xlu0 %v892_v23, %s1291_s24 }
0x14b8   :  { %v895_v25 = vpop.permute.xlu0 %894 }
0x14b9   :  { %v897_v26 = vadd.f32 %v895_v25, %v887_v24 }
0x14bb   :  { %1180 = vtanh.f32 %v897_v26 }
0x14c8   :  { %v1181_v27 = vpop.eup %1180 }
0x14c9   :  { %900 = vrot.lane.b32.xlu1 %v1181_v27, %s1298_s12 }
0x14cd   :  { %912 = vrot.lane.b32.xlu1 %v897_v26, %s1299_s3 }
0x153b   :  { %v901_v28 = vpop.permute.xlu1 %900 }
0x153c   :  { %v903_v29 = vmul.f32 %v1179_v21, %v901_v28 }
0x153e   :  { %905 = vrot.lane.b32.xlu0 %v903_v29, %s1291_s24 }
0x153f   :  { %v913_v30 = vpop.permute.xlu1 %912 }
0x1540   :  { %915 = vst.msk [vmem:[#allocation10] sm:$0x3] %vm55_vm1, %v913_v30 }
0x15b0   :  { %v906_v31 = vpop.permute.xlu0 %905 }
0x15b1   :  { %909 = vst.msk [vmem:[#allocation7 + $0xe] sm:$0x3] %vm55_vm1, %v906_v31  ;;  %910 = vst.msk [vmem:[#allocation8] sm:$0x3] %vm55_vm1, %v906_v31 }
0x15b2   :  { %1233 = shalt.err (!%p1230_p0)
}
0x15b3   :  { %937 = dma.vmem_to_hbm [thread:$0]  %s935_s14, 32, %s1511_s5, [#allocation9]  }
0x15b4   :  { %s1242_s22 = scalar_lea.vmem %s922_s16, 256  ;;  %p1247_p2 = scmp.lt.s32.totalorder %s922_s16, %s922_s16 }
0x15b5   :  { %p1243_p1 = scmp.ne.s32.totalorder %s922_s16, %s1242_s22  ;;  %p1248_p3 = scmp.lt.s32.totalorder %s1242_s22, %s1242_s22 }
0x15b7   :  { %p1249_p4 = por %p1248_p3, %p1247_p2 }
0x15b9   :  { %p1250_p5 = pnand %p1249_p4, %p1243_p1 }
0x15bb   :  { %1253 = shalt.err (!%p1250_p5)
}
0x15bc   :  { %927 = dma.vmem_to_hbm [thread:$0]  %s922_s16, 256, %s1510_s4, [#allocation4], %s1291_s24, %s1291_s24, %s1292_s25  }
0x15bd   :  { %s1262_s27 = scalar_lea.vmem %s945_s18, 32  ;;  %p1267_p7 = scmp.lt.s32.totalorder %s945_s18, %s945_s18 }
0x15be   :  { %p1263_p6 = scmp.ne.s32.totalorder %s945_s18, %s1262_s27  ;;  %p1268_p8 = scmp.lt.s32.totalorder %s1262_s27, %s1262_s27 }
0x15c0   :  { %p1269_p9 = por %p1268_p8, %p1267_p7 }
0x15c2   :  { %p1270_p10 = pnand %p1269_p9, %p1263_p6 }
0x15c4   :  { %1273 = shalt.err (!%p1270_p10)
}
0x15c5   :  { %947 = dma.vmem_to_hbm [thread:$0]  %s945_s18, 32, %s1512_s6, [#allocation9]  }
0x15c6   :  { %1286 = dma.done.wait [#allocation4], 256  }
0x15c7   :  { %1287 = vsyncadd [#allocation4], 4294967040 }
0x15c8   :  { %1288 = dma.done.wait [#allocation9], 64  }
0x15c9   :  { %1289 = vsyncadd [#allocation9], 4294967232 }
0x15ca   :  { %957 = vsyncpa [#allocation3], 1 }
0x15cb   :  { %958 = vsyncpa [#allocation6], 1 }
0x15cc   :  { %959 = vsyncpa [#allocation4], 1 }
0x15cd   :  { %960 = vsyncpa [#allocation9], 1 }

</bundles_post_ra>
